<compile_context>
chip_gen: v7x
topology: tpu7x:2x2x1
jax: 0.10.0
libtpu: 0.0.40
codegen_flags: <defaults>
</compile_context>

<pallas_src>
import math
from typing import NamedTuple

import jax
import jax.numpy as jnp
from jax.experimental import pallas as pl
from jax.experimental.pallas import tpu as pltpu


FREQ_EMB_SIZE = 256          # frequency_embedding_size (even -> no zero-pad branch)
HALF = FREQ_EMB_SIZE // 2    # 128: one full lane width / native MXU depth
MAX_PERIOD = 10000.0

# Conservative per-step VMEM budget (fits v7x 64 MiB physical with headroom).
_VMEM_BUDGET_BYTES = 40 * 1024 * 1024


def _round_up(x, m):
    return (x + m - 1) // m * m


def _vmem_estimate_bytes(n_p, h_in, tn, out_itemsize):
    """Per-step VMEM residency estimate (assumes default double-buffering)."""
    w2_buf = 2 * h_in * tn * 2          # double-buffered bf16 W2 column tile
    w1_buf = 2 * 2 * HALF * h_in * 2    # two bf16 W1 halves, assume double-buffered
    h_scratch = n_p * h_in * 2          # bf16 hidden activation scratch
    out_buf = 2 * n_p * tn * out_itemsize
    misc = 2 * ((h_in + tn) * 4 + n_p * 4 + HALF * 4)   # biases, t, freqs
    return w2_buf + w1_buf + h_scratch + out_buf + misc


class TimestepEmbedderParams(NamedTuple):
    """Padded / pre-split / bf16 operands.  Build ONCE at parameter-load time."""
    freqs: jax.Array   # (1, HALF) f32 static frequency table
    w1c: jax.Array     # (HALF, h_in) bf16, cos-half of W1
    w1s: jax.Array     # (HALF, h_in) bf16, sin-half of W1
    b1p: jax.Array     # (1, h_in) f32
    w2p: jax.Array     # (h_in, h_out) bf16
    b2p: jax.Array     # (1, h_out) f32
    hidden: int        # logical hidden size
    h_in: int          # hidden padded to 128 (K dim of second Linear)
    h_out: int         # hidden padded to a multiple of tn (output columns)
    tn: int            # W2 output-column tile width


def prepare_timestep_embedder_params(w1, b1, w2, b2):
    """Hoisted (one-time) weight prep: pad, split W1, cast weights to bf16.

    w1: (FREQ_EMB_SIZE, hidden), b1: (hidden,), w2: (hidden, hidden), b2: (hidden,)
    (transposed vs. PyTorch nn.Linear storage).
    """
    assert w1.shape[0] == FREQ_EMB_SIZE
    hidden = w1.shape[1]

    h_in = _round_up(hidden, 128)            # lane-aligned K dim / hidden activation
    # Fat output-column tiles independent of hidden's divisors; cap for VMEM.
    tn = 128
    for cand in (512, 256):
        if cand <= h_in and _vmem_estimate_bytes(8, h_in, cand, 4) <= _VMEM_BUDGET_BYTES:
            tn = cand
            break
    h_out = _round_up(hidden, tn)            # only W2 columns / output padded to tn

    freqs = jnp.exp(
        (-math.log(MAX_PERIOD) / HALF) * jnp.arange(HALF, dtype=jnp.float32)
    ).reshape(1, HALF)                       # static table, hoisted out of the kernel

    w1f = w1.astype(jnp.float32)
    w1c = jnp.zeros((HALF, h_in), jnp.bfloat16).at[:, :hidden].set(
        w1f[:HALF].astype(jnp.bfloat16))     # cos-half of W1
    w1s = jnp.zeros((HALF, h_in), jnp.bfloat16).at[:, :hidden].set(
        w1f[HALF:].astype(jnp.bfloat16))     # sin-half of W1
    b1p = jnp.zeros((1, h_in), jnp.float32).at[0, :hidden].set(b1.astype(jnp.float32))
    w2p = jnp.zeros((h_in, h_out), jnp.bfloat16).at[:hidden, :hidden].set(
        w2.astype(jnp.bfloat16))
    b2p = jnp.zeros((1, h_out), jnp.float32).at[0, :hidden].set(b2.astype(jnp.float32))

    return TimestepEmbedderParams(freqs, w1c, w1s, b1p, w2p, b2p,
                                  hidden, h_in, h_out, tn)


def _timestep_embedder_kernel(t_ref, freqs_ref, w1c_ref, w1s_ref, b1_ref,
                              w2_ref, b2_ref, o_ref, h_ref):
    # Grid axis 0 tiles W2 / the output over columns.  The hidden activation `h`
    # depends only on the fully-resident first layer, so compute it once at j==0
    # into VMEM scratch (bf16) and reuse it for every output-column tile.
    @pl.when(pl.program_id(0) == 0)
    def _():
        args = t_ref[...] * freqs_ref[...]                 # (n_p, 128) f32
        cos_e = jnp.cos(args).astype(jnp.bfloat16)         # cast only at dot inputs
        sin_e = jnp.sin(args).astype(jnp.bfloat16)
        # Two K=128 bf16 MXU matmuls accumulated in f32 replace the lane-axis concat.
        h = jnp.dot(cos_e, w1c_ref[...], preferred_element_type=jnp.float32)
        h = h + jnp.dot(sin_e, w1s_ref[...], preferred_element_type=jnp.float32)
        h = h + b1_ref[...]
        # SiLU in f32, stored once as bf16 (the dtype the second matmul consumes).
        h_ref[...] = (h * jax.nn.sigmoid(h)).astype(h_ref.dtype)

    out = jnp.dot(h_ref[...], w2_ref[...],
                  preferred_element_type=jnp.float32) + b2_ref[...]
    o_ref[...] = out.astype(o_ref.dtype)


def timestep_embedder(t, params: TimestepEmbedderParams, *, out_dtype=jnp.float32):
    """Per-step path: t (N,) timesteps + pre-built params -> (N, hidden) embedding."""
    n = t.shape[0]
    hidden, h_in, h_out, tn = params.hidden, params.h_in, params.h_out, params.tn

    n_p = _round_up(n, 8)                    # sublane-aligned batch
    t_pad = jnp.zeros((n_p, 1), jnp.float32).at[:n, 0].set(t.astype(jnp.float32))

    grid = (h_out // tn,)
    out_itemsize = jnp.dtype(out_dtype).itemsize

    vmem_limit = int(min(
        max(1.2 * _vmem_estimate_bytes(n_p, h_in, tn, out_itemsize) + (1 << 20),
            32 << 20),
        64 << 20))                           # covers v5e 16 MiB / v6e-v7x defaults

    cost = pl.CostEstimate(
        flops=2 * n_p * FREQ_EMB_SIZE * h_in + 2 * n_p * h_in * h_out
              + 3 * n_p * (h_in + h_out),
        transcendentals=n_p * FREQ_EMB_SIZE + n_p * h_in,
        bytes_accessed=(2 * HALF * h_in * 2) + (h_in * h_out * 2)
                       + (h_in + h_out) * 4 + n_p * 4 + HALF * 4
                       + n_p * h_out * out_itemsize)

    def full(shape):
        return pl.BlockSpec(shape, lambda j: (0, 0))

    # TODO(synk): if MLIR/VMEM accounting shows the grid-invariant inputs (t, freqs,
    # W1 halves, b1) are still double-buffered, single-buffer them via
    # pipeline_mode=pl.Buffered(1) to free VMEM for a larger tn on v7x.
    # TODO(synk): for large batch N on v7x, add a leading "parallel" grid axis over
    # N (recomputing h per tile) to use both TensorCores; N here is tiny.
    out_pad = pl.pallas_call(
        _timestep_embedder_kernel,
        out_shape=jax.ShapeDtypeStruct((n_p, h_out), out_dtype),
        grid_spec=pltpu.PrefetchScalarGridSpec(
            num_scalar_prefetch=0,
            grid=grid,
            in_specs=[
                full((n_p, 1)),                              # t
                full((1, HALF)),                             # freqs (static)
                full((HALF, h_in)),                          # W1 cos-half (bf16)
                full((HALF, h_in)),                          # W1 sin-half (bf16)
                full((1, h_in)),                             # b1
                pl.BlockSpec((h_in, tn), lambda j: (0, j)),  # W2 column tile (bf16)
                pl.BlockSpec((1, tn), lambda j: (0, j)),     # b2 tile
            ],
            out_specs=pl.BlockSpec((n_p, tn), lambda j: (0, j)),
            scratch_shapes=[pltpu.VMEM((n_p, h_in), jnp.bfloat16)],  # hidden act h
        ),
        compiler_params=pltpu.CompilerParams(
            dimension_semantics=("arbitrary",),   # h scratch carried across tiles
            vmem_limit_bytes=vmem_limit),
        cost_estimate=cost,
    )(t_pad, params.freqs, params.w1c, params.w1s, params.b1p,
      params.w2p, params.b2p)

    return out_pad[:n, :hidden]


def _reference(t, w1, b1, w2, b2):
    """Pure-JAX f32 reference matching the PyTorch module semantics."""
    half = FREQ_EMB_SIZE // 2
    freqs = jnp.exp(-math.log(MAX_PERIOD) * jnp.arange(half, dtype=jnp.float32) / half)
    args = t.astype(jnp.float32)[:, None] * freqs[None]
    emb = jnp.concatenate([jnp.cos(args), jnp.sin(args)], axis=-1)
    h = emb @ w1 + b1
    h = h * jax.nn.sigmoid(h)
    return h @ w2 + b2


if __name__ == "__main__":
    N = 8          # number of timesteps (batch)
    HIDDEN = 32    # hidden_size

    key = jax.random.PRNGKey(0)
    k_t, k_w1, k_b1, k_w2, k_b2 = jax.random.split(key, 5)

    t = jax.random.uniform(k_t, (N,), dtype=jnp.float32) * 1000.0
    # PyTorch Linear weights stored transposed: (in_features, out_features).
    w1 = jax.random.normal(k_w1, (FREQ_EMB_SIZE, HIDDEN), dtype=jnp.float32) * 0.02
    b1 = jax.random.normal(k_b1, (HIDDEN,), dtype=jnp.float32) * 0.02
    w2 = jax.random.normal(k_w2, (HIDDEN, HIDDEN), dtype=jnp.float32) * 0.02
    b2 = jax.random.normal(k_b2, (HIDDEN,), dtype=jnp.float32) * 0.02

    # One-time (parameter-load-time) weight prep, hoisted out of the per-step path.
    params = prepare_timestep_embedder_params(w1, b1, w2, b2)
    jax.block_until_ready(params.w2p)

    out = timestep_embedder(t, params)
    jax.block_until_ready(out)

    ref = _reference(t, w1, b1, w2, b2)
    assert out.shape == (N, HIDDEN)
    # bf16 matmul inputs (f32 accumulation) -> looser tolerance than pure f32.
    assert jnp.allclose(out, ref, atol=2e-3, rtol=2e-2), "mismatch vs reference"

    print("KERNEL_OK")
</pallas_src>

<mosaic_0001>
module attributes {stable_mosaic.version = 11 : i64} {
  func.func @_timestep_embedder_kernel(%arg0: i32, %arg1: memref<8x1xf32, #tpu.memory_space<vmem>>, %arg2: memref<1x128xf32, #tpu.memory_space<vmem>>, %arg3: memref<128x128xbf16, #tpu.memory_space<vmem>>, %arg4: memref<128x128xbf16, #tpu.memory_space<vmem>>, %arg5: memref<1x128xf32, #tpu.memory_space<vmem>>, %arg6: memref<128x128xbf16, #tpu.memory_space<vmem>>, %arg7: memref<1x128xf32, #tpu.memory_space<vmem>>, %arg8: memref<8x128xf32, #tpu.memory_space<vmem>>, %arg9: memref<8x128xbf16, #tpu.memory_space<vmem>>) attributes {dimension_semantics = [#tpu.dimension_semantics<arbitrary>], iteration_bounds = array<i64: 1>, scalar_prefetch = 0 : i64, scratch_operands = 1 : i64, tpu.core_type = #tpu.core_type<tc>, window_params = [{pipeline_mode = #tpu.pipeline_mode<synchronous>, transform_indices = @transform_0, window_bounds = array<i64: 8, 1>}, {pipeline_mode = #tpu.pipeline_mode<synchronous>, transform_indices = @transform_1, window_bounds = array<i64: 1, 128>}, {pipeline_mode = #tpu.pipeline_mode<synchronous>, transform_indices = @transform_2, window_bounds = array<i64: 128, 128>}, {pipeline_mode = #tpu.pipeline_mode<synchronous>, transform_indices = @transform_3, window_bounds = array<i64: 128, 128>}, {pipeline_mode = #tpu.pipeline_mode<synchronous>, transform_indices = @transform_4, window_bounds = array<i64: 1, 128>}, {transform_indices = @transform_5, window_bounds = array<i64: 128, 128>}, {transform_indices = @transform_6, window_bounds = array<i64: 1, 128>}, {transform_indices = @transform_7, window_bounds = array<i64: 8, 128>}]} {
    %c0_i32 = arith.constant 0 : i32
    %0 = arith.cmpi eq, %arg0, %c0_i32 : i32
    %1 = arith.extui %0 : i1 to i32
    %c0_i32_0 = arith.constant 0 : i32
    %2 = arith.cmpi ne, %1, %c0_i32_0 : i32
    scf.if %2 {
      %c0_8 = arith.constant 0 : index
      %c0_9 = arith.constant 0 : index
      %10 = vector.load %arg1[%c0_8, %c0_9] : memref<8x1xf32, #tpu.memory_space<vmem>>, vector<8x1xf32>
      %c0_10 = arith.constant 0 : index
      %c0_11 = arith.constant 0 : index
      %11 = vector.load %arg2[%c0_10, %c0_11] : memref<1x128xf32, #tpu.memory_space<vmem>>, vector<1x128xf32>
      %12 = vector.broadcast %10 : vector<8x1xf32> to vector<8x128xf32>
      %13 = vector.broadcast %11 : vector<1x128xf32> to vector<8x128xf32>
      %14 = arith.mulf %12, %13 : vector<8x128xf32>
      %15 = math.cos %14 : vector<8x128xf32>
      %16 = arith.truncf %15 : vector<8x128xf32> to vector<8x128xbf16>
      %17 = math.sin %14 : vector<8x128xf32>
      %18 = arith.truncf %17 : vector<8x128xf32> to vector<8x128xbf16>
      %c0_12 = arith.constant 0 : index
      %c0_13 = arith.constant 0 : index
      %19 = vector.load %arg3[%c0_12, %c0_13] : memref<128x128xbf16, #tpu.memory_space<vmem>>, vector<128x128xbf16>
      %cst_14 = arith.constant dense<0.000000e+00> : vector<8x128xf32>
      %20 = tpu.matmul %16, %19, %cst_14 {dimension_numbers = #tpu.dot_dimension_numbers<[1], [0], [0], [1], [0, 0, 1, 1], [], []>} : vector<8x128xbf16>, vector<128x128xbf16>, vector<8x128xf32> -> vector<8x128xf32>
      %c0_15 = arith.constant 0 : index
      %c0_16 = arith.constant 0 : index
      %21 = vector.load %arg4[%c0_15, %c0_16] : memref<128x128xbf16, #tpu.memory_space<vmem>>, vector<128x128xbf16>
      %cst_17 = arith.constant dense<0.000000e+00> : vector<8x128xf32>
      %22 = tpu.matmul %18, %21, %cst_17 {dimension_numbers = #tpu.dot_dimension_numbers<[1], [0], [0], [1], [0, 0, 1, 1], [], []>} : vector<8x128xbf16>, vector<128x128xbf16>, vector<8x128xf32> -> vector<8x128xf32>
      %23 = arith.addf %20, %22 : vector<8x128xf32>
      %c0_18 = arith.constant 0 : index
      %c0_19 = arith.constant 0 : index
      %24 = vector.load %arg5[%c0_18, %c0_19] : memref<1x128xf32, #tpu.memory_space<vmem>>, vector<1x128xf32>
      %25 = vector.broadcast %24 : vector<1x128xf32> to vector<8x128xf32>
      %26 = arith.addf %23, %25 : vector<8x128xf32>
      %27 = arith.negf %26 : vector<8x128xf32>
      %28 = math.exp %27 : vector<8x128xf32>
      %cst_20 = arith.constant 1.000000e+00 : f32
      %29 = vector.broadcast %cst_20 : f32 to vector<8x128xf32>
      %30 = arith.addf %29, %28 : vector<8x128xf32>
      %31 = arith.divf %29, %30 : vector<8x128xf32>
      %32 = arith.mulf %26, %31 : vector<8x128xf32>
      %33 = arith.truncf %32 : vector<8x128xf32> to vector<8x128xbf16>
      %c0_21 = arith.constant 0 : index
      %c0_22 = arith.constant 0 : index
      %34 = vector.load %arg9[%c0_21, %c0_22] : memref<8x128xbf16, #tpu.memory_space<vmem>>, vector<8x128xbf16>
      tpu.vector_store %arg9[%c0_21, %c0_22], %33 {strides = array<i32>} : memref<8x128xbf16, #tpu.memory_space<vmem>>, vector<8x128xbf16>,
    } else {
    }
    %c0 = arith.constant 0 : index
    %c0_1 = arith.constant 0 : index
    %3 = vector.load %arg9[%c0, %c0_1] : memref<8x128xbf16, #tpu.memory_space<vmem>>, vector<8x128xbf16>
    %c0_2 = arith.constant 0 : index
    %c0_3 = arith.constant 0 : index
    %4 = vector.load %arg6[%c0_2, %c0_3] : memref<128x128xbf16, #tpu.memory_space<vmem>>, vector<128x128xbf16>
    %cst = arith.constant dense<0.000000e+00> : vector<8x128xf32>
    %5 = tpu.matmul %3, %4, %cst {dimension_numbers = #tpu.dot_dimension_numbers<[1], [0], [0], [1], [0, 0, 1, 1], [], []>} : vector<8x128xbf16>, vector<128x128xbf16>, vector<8x128xf32> -> vector<8x128xf32>
    %c0_4 = arith.constant 0 : index
    %c0_5 = arith.constant 0 : index
    %6 = vector.load %arg7[%c0_4, %c0_5] : memref<1x128xf32, #tpu.memory_space<vmem>>, vector<1x128xf32>
    %7 = vector.broadcast %6 : vector<1x128xf32> to vector<8x128xf32>
    %8 = arith.addf %5, %7 : vector<8x128xf32>
    %c0_6 = arith.constant 0 : index
    %c0_7 = arith.constant 0 : index
    %9 = vector.load %arg8[%c0_6, %c0_7] : memref<8x128xf32, #tpu.memory_space<vmem>>, vector<8x128xf32>
    tpu.vector_store %arg8[%c0_6, %c0_7], %8 {strides = array<i32>} : memref<8x128xf32, #tpu.memory_space<vmem>>, vector<8x128xf32>,
    return
  }
  func.func @transform_0(%arg0: i32) -> (i32, i32) {
    %c0_i32 = arith.constant 0 : i32
    %c0_i32_0 = arith.constant 0 : i32
    %c0_i32_1 = arith.constant 0 : i32
    return %c0_i32, %c0_i32_0 : i32, i32
  }
  func.func @transform_1(%arg0: i32) -> (i32, i32) {
    %c0_i32 = arith.constant 0 : i32
    %c0_i32_0 = arith.constant 0 : i32
    %c0_i32_1 = arith.constant 0 : i32
    return %c0_i32, %c0_i32_0 : i32, i32
  }
  func.func @transform_2(%arg0: i32) -> (i32, i32) {
    %c0_i32 = arith.constant 0 : i32
    %c0_i32_0 = arith.constant 0 : i32
    %c0_i32_1 = arith.constant 0 : i32
    return %c0_i32, %c0_i32_0 : i32, i32
  }
  func.func @transform_3(%arg0: i32) -> (i32, i32) {
    %c0_i32 = arith.constant 0 : i32
    %c0_i32_0 = arith.constant 0 : i32
    %c0_i32_1 = arith.constant 0 : i32
    return %c0_i32, %c0_i32_0 : i32, i32
  }
  func.func @transform_4(%arg0: i32) -> (i32, i32) {
    %c0_i32 = arith.constant 0 : i32
    %c0_i32_0 = arith.constant 0 : i32
    %c0_i32_1 = arith.constant 0 : i32
    return %c0_i32, %c0_i32_0 : i32, i32
  }
  func.func @transform_5(%arg0: i32) -> (i32, i32) {
    %c0_i32 = arith.constant 0 : i32
    %c0_i32_0 = arith.constant 0 : i32
    return %c0_i32, %arg0 : i32, i32
  }
  func.func @transform_6(%arg0: i32) -> (i32, i32) {
    %c0_i32 = arith.constant 0 : i32
    %c0_i32_0 = arith.constant 0 : i32
    return %c0_i32, %arg0 : i32, i32
  }
  func.func @transform_7(%arg0: i32) -> (i32, i32) {
    %c0_i32 = arith.constant 0 : i32
    %c0_i32_0 = arith.constant 0 : i32
    return %c0_i32, %arg0 : i32, i32
  }
}

</mosaic_0001>

<bundles_post_ra>
// kernel: tpu_custom_call.1
= control target key start
LH: loop header
LB: loop body
LE: loop exit
PB: predicated region body
PF: predicated region fallthrough
CT: control target
= control target key end

     0   :  { %12 = vsyncpa [#allocation4], 0  ;;  %s1101_s0 = inlined_call_operand.vmem [shape: f32[8,1], index: 0, kind: input, shape index: {}]   ;;  %s1102_s1 = inlined_call_operand.vmem [shape: f32[1,128], index: 1, kind: input, shape index: {}]   ;;  %s1103_s2 = inlined_call_operand.hbm [shape: bf16[128,128], index: 2, kind: input, shape index: {}]   ;;  %s1104_s3 = inlined_call_operand.hbm [shape: bf16[128,128], index: 3, kind: input, shape index: {}]   ;;  %s1105_s4 = inlined_call_operand.vmem [shape: f32[1,128], index: 4, kind: input, shape index: {}]   ;;  %s1106_s5 = inlined_call_operand.hbm [shape: bf16[128,128], index: 5, kind: input, shape index: {}]   ;;  %s1107_s6 = inlined_call_operand.vmem [shape: f32[1,128], index: 6, kind: input, shape index: {}]   ;;  %s1108_s7 = inlined_call_operand.hbm [shape: f32[8,128], index: 7, kind: output, shape index: {}]  }
   0x1   :  { %13 = vsyncpa [#allocation7], 0 }
   0x2   :  { %14 = vsyncpa [#allocation5], 0  ;;  %s919_s24 = smov [#allocation6]   ;;  %s920_s26 = smov [#allocation3]  }
   0x3   :  { %s36_s25 = sshll.u32 %s919_s24, 4  ;;  %s24_s27 = sshll.u32 %s920_s26, 4  ;;  %s37_s25 = int_to_ptr.vmem [resolvable:$true] %s36_s25  ;;  %s974_s27 = int_to_ptr.vmem [resolvable:$true] %s24_s27 }
   0x4   :  { %s825_s30 = scalar_lea.hbm %s1104_s3, 1024 }
   0x5   :  { %p826_p0 = scmp.ne.s32.totalorder %s1104_s3, %s825_s30  ;;  %p829_p1 = scmp.lt.u32.totalorder %s825_s30, %s1104_s3 }
   0x7   :  { %p831_p2 = pnand %p829_p1, %p826_p0 }
   0x9   :  { %834 = shalt.err (!%p831_p2)
}
   0xa   :  { %s835_s12 = scalar_lea.vmem %s37_s25, 1024  ;;  %p840_p4 = scmp.lt.s32.totalorder %s37_s25, %s37_s25 }
   0xb   :  { %p836_p3 = scmp.ne.s32.totalorder %s37_s25, %s835_s12  ;;  %p841_p5 = scmp.lt.s32.totalorder %s835_s12, %s835_s12 }
   0xd   :  { %p842_p6 = por %p841_p5, %p840_p4 }
   0xf   :  { %p843_p7 = pnand %p842_p6, %p836_p3 }
  0x11   :  { %846 = shalt.err (!%p843_p7)
}
  0x12   :  { %s921_s13 = smov 64   ;;  %s922_s14 = smov 4  }
  0x13   :  { %42 = dma.hbm_to_vmem [thread:$0]  %s1104_s3, 1024, %s37_s25, [#allocation7], %s921_s13, %s921_s13, %s922_s14  }
  0x14   :  { %s847_s19 = scalar_lea.hbm %s1103_s2, 1024 }
  0x15   :  { %p848_p8 = scmp.ne.s32.totalorder %s1103_s2, %s847_s19  ;;  %p851_p9 = scmp.lt.u32.totalorder %s847_s19, %s1103_s2 }
  0x17   :  { %p853_p10 = pnand %p851_p9, %p848_p8 }
  0x19   :  { %856 = shalt.err (!%p853_p10)
}
  0x1a   :  { %s857_s24 = scalar_lea.vmem %s974_s27, 1024  ;;  %p862_p12 = scmp.lt.s32.totalorder %s974_s27, %s974_s27 }
  0x1b   :  { %p858_p11 = scmp.ne.s32.totalorder %s974_s27, %s857_s24  ;;  %p863_p13 = scmp.lt.s32.totalorder %s857_s24, %s857_s24 }
  0x1d   :  { %p864_p0 = por %p863_p13, %p862_p12 }
  0x1f   :  { %p865_p1 = pnand %p864_p0, %p858_p11 }
  0x21   :  { %868 = shalt.err (!%p865_p1)
}
  0x22   :  { %30 = dma.hbm_to_vmem [thread:$0]  %s1103_s2, 1024, %s974_s27, [#allocation4], %s921_s13, %s921_s13, %s922_s14  }
  0x23   :  { %s923_s26 = smov [#allocation8]   ;;  %s869_s8 = scalar_lea.hbm %s1106_s5, 1024 }
  0x24   :  { %s50_s28 = sshll.u32 %s923_s26, 4  ;;  %p870_p2 = scmp.ne.s32.totalorder %s1106_s5, %s869_s8  ;;  %s51_s28 = int_to_ptr.vmem [resolvable:$true] %s50_s28 }
  0x25   :  { %p873_p3 = scmp.lt.u32.totalorder %s869_s8, %s1106_s5 }
  0x27   :  { %p875_p4 = pnand %p873_p3, %p870_p2 }
  0x29   :  { %878 = shalt.err (!%p875_p4)
}
  0x2a   :  { %s879_s15 = scalar_lea.vmem %s51_s28, 1024  ;;  %p884_p6 = scmp.lt.s32.totalorder %s51_s28, %s51_s28 }
  0x2b   :  { %p880_p5 = scmp.ne.s32.totalorder %s51_s28, %s879_s15  ;;  %p885_p7 = scmp.lt.s32.totalorder %s879_s15, %s879_s15 }
  0x2d   :  { %p886_p8 = por %p885_p7, %p884_p6 }
  0x2f   :  { %p887_p9 = pnand %p886_p8, %p880_p5 }
  0x31   :  { %890 = shalt.err (!%p887_p9)
}
  0x32   :  { %56 = dma.hbm_to_vmem [thread:$0]  %s1106_s5, 1024, %s51_s28, [#allocation7], %s921_s13, %s921_s13, %s922_s14  }
  0x33   :  { %913 = dma.done.wait [#allocation4], 1024  }
  0x34   :  { %914 = vsyncadd [#allocation4], 4294966272 }
  0x35   :  { %915 = dma.done.wait [#allocation7], 2048  }
  0x36   :  { %916 = vsyncadd [#allocation7], 4294965248  ;;  %v924_v0 = vmov 0   ;;  %v73_v1 = vld [vmem:[%s1101_s0] sm:$0xff]  ;;  %v925_v4 = vmov 0.0   ;;  %v795_v5 = vld [vmem:[#allocation6 + $0x8] sm:$0xff]  }
  0x37   :  { %792 = vset.pattern.permute.xlu0 %v924_v0  ;;  %v793_v2 = vld [vmem:[#allocation6] sm:$0xff]   ;;  %713 = vmatprep.subr.bf16.mxu0 %v925_v4  ;;  %v796_v6 = vld [vmem:[#allocation3 + $0x8] sm:$0xff]   ;;  %v797_v7 = vld [vmem:[#allocation6 + $0x10] sm:$0xff]   ;;  %vm926_vm0 = vmmov 0   ;;  %v927_v32 = vmov 683565275  }
  0x38   :  { %77 = vperm.xlu0 %792, %v73_v1   ;;  %v794_v3 = vld [vmem:[#allocation3] sm:$0xff]   ;;  %733 = vmatprep.subr.bf16.mxu1 %v925_v4  ;;  %v798_v8 = vld [vmem:[#allocation3 + $0x10] sm:$0xff]   ;;  %v799_v9 = vld [vmem:[#allocation6 + $0x18] sm:$0xff]   ;;  %v928_v34 = vmov 2475754826   ;;  %s933_s18 = smov [#allocation9]  }
  0x39   :  { %714 = vmatpush3.bf16.msra.mxu0 %v793_v2  ;;  %734 = vmatpush3.bf16.msra.mxu1 %v794_v3  ;;  %v800_v10 = vld [vmem:[#allocation3 + $0x18] sm:$0xff]   ;;  %v801_v11 = vld [vmem:[#allocation6 + $0x20] sm:$0xff]   ;;  %v803_v13 = vld [vmem:[#allocation6 + $0x28] sm:$0xff]   ;;  %v929_v37 = vmov 2131351028   ;;  %s640_s19 = sshll.u32 %s933_s18, 4  ;;  %s641_s19 = int_to_ptr.vmem [resolvable:$true] %s640_s19 }
  0x3a   :  { %715 = vmatprep.subr.bf16.mxu0 %v925_v4  ;;  %735 = vmatprep.subr.bf16.mxu1 %v925_v4  ;;  %v802_v12 = vld [vmem:[#allocation3 + $0x20] sm:$0xff]   ;;  %v804_v14 = vld [vmem:[#allocation3 + $0x28] sm:$0xff]   ;;  %v805_v15 = vld [vmem:[#allocation6 + $0x30] sm:$0xff]   ;;  %v930_v40 = vmov 2102212464   ;;  %s891_s20 = scalar_lea.vmem %s641_s19, 128  ;;  %p896_p11 = scmp.lt.s32.totalorder %s641_s19, %s641_s19 }
  0x3b   :  { %729 = vmatprep.mubr.msk.bf16.mxu0 %vm926_vm0, %v925_v4  ;;  %749 = vmatprep.mubr.msk.bf16.mxu1 %vm926_vm0, %v925_v4  ;;  %v806_v16 = vld [vmem:[#allocation3 + $0x30] sm:$0xff]   ;;  %v807_v17 = vld [vmem:[#allocation6 + $0x38] sm:$0xff]   ;;  %v931_v43 = vmov 920167782   ;;  %v932_v46 = vmov 1326507024   ;;  %p892_p10 = scmp.ne.s32.totalorder %s641_s19, %s891_s20  ;;  %p897_p12 = scmp.lt.s32.totalorder %s891_s20, %s891_s20 }
  0x3c   :  { %v808_v18 = vld [vmem:[#allocation3 + $0x38] sm:$0xff]  }
  0x3d   :  { %716 = vmatpush3.bf16.msra.mxu0 %v795_v5  ;;  %736 = vmatpush3.bf16.msra.mxu1 %v796_v6  ;;  %v650_v19 = vld [vmem:[%s1102_s1] ss:$0 sm:$0xff]  ;;  %p898_p13 = por %p897_p12, %p896_p11 }
  0x3e   :  { %717 = vmatprep.subr.bf16.mxu0 %v925_v4  ;;  %737 = vmatprep.subr.bf16.mxu1 %v925_v4 }
  0x3f   :  { %p899_p0 = pnand %p898_p13, %p892_p10 }
  0x41   :  { %718 = vmatpush3.bf16.msra.mxu0 %v797_v7  ;;  %738 = vmatpush3.bf16.msra.mxu1 %v798_v8 }
  0x42   :  { %719 = vmatprep.subr.bf16.mxu0 %v925_v4  ;;  %739 = vmatprep.subr.bf16.mxu1 %v925_v4 }
  0x45   :  { %720 = vmatpush3.bf16.msra.mxu0 %v799_v9  ;;  %740 = vmatpush3.bf16.msra.mxu1 %v800_v10 }
  0x46   :  { %721 = vmatprep.subr.bf16.mxu0 %v925_v4  ;;  %741 = vmatprep.subr.bf16.mxu1 %v925_v4 }
  0x49   :  { %722 = vmatpush3.bf16.msra.mxu0 %v801_v11  ;;  %742 = vmatpush3.bf16.msra.mxu1 %v802_v12 }
  0x4a   :  { %723 = vmatprep.subr.bf16.mxu0 %v925_v4  ;;  %743 = vmatprep.subr.bf16.mxu1 %v925_v4 }
  0x4d   :  { %724 = vmatpush3.bf16.msra.mxu0 %v803_v13  ;;  %744 = vmatpush3.bf16.msra.mxu1 %v804_v14 }
  0x4e   :  { %725 = vmatprep.subr.bf16.mxu0 %v925_v4  ;;  %745 = vmatprep.subr.bf16.mxu1 %v925_v4 }
  0x51   :  { %726 = vmatpush3.bf16.msra.mxu0 %v805_v15  ;;  %746 = vmatpush3.bf16.msra.mxu1 %v806_v16 }
  0x52   :  { %727 = vmatprep.subr.bf16.mxu0 %v925_v4  ;;  %747 = vmatprep.subr.bf16.mxu1 %v925_v4 }
  0x55   :  { %728 = vmatpush3.bf16.msra.mxu0 %v807_v17  ;;  %748 = vmatpush3.bf16.msra.mxu1 %v808_v18 }
  0x56   :  { %753 = vmatprep.subr.bf16.mxu0 %v925_v4 }
  0xb7   :  { %v78_v20 = vpop.permute.xlu0 %77 }
  0xb8   :  { %v1053_v21 = vmul.f32 %v650_v19, %v78_v20 }
  0xba   :  { %v90_v22 = vand.u32 2139095040, %v1053_v21  ;;  %v87_v26 = vand.u32 2147483647, %v1053_v21  ;;  %vm89_vm8 = vcmp.lt.s32.totalorder %v1053_v21, 0 }
  0xbc   :  { %v91_v23 = vshrl.u32 %v90_v22, 23  ;;  %v94_v29 = vand.u32 8388607, %v87_v26  ;;  %vm88_vm9 = vcmp.le.f32.partialorder %v87_v26, 0.7853982 }
  0xbe   :  { %v651_v24 = vadd.s32 4294967169, %v91_v23  ;;  %v95_v48 = vor.u32 8388608, %v94_v29 }
  0xc0   :  { %v97_v25 = vadd.s32 1, %v651_v24  ;;  %v135_v62 = vshll.u32 %v95_v48, 8 }
  0xc2   :  { %vm98_vm1 = vcmp.gt.s32.totalorder %v97_v25, 0 }
  0xc3   :  { %v99_v27 = vsel %vm98_vm1, %v97_v25, 0  ;;  %vm179_vm1 = vweird.f32 %v1053_v21 }
  0xc4   :  { %v101_v28 = vand.u32 31, %v99_v27  ;;  %v100_v31 = vshrl.u32 %v99_v27, 5 }
  0xc6   :  { %v102_v30 = vsub.s32 32, %v101_v28  ;;  %v104_v33 = vshll.u32 %v927_v32, %v101_v28  ;;  %v107_v35 = vshll.u32 %v928_v34, %v101_v28  ;;  %v110_v39 = vshll.u32 %v929_v37, %v101_v28 }
  0xc7   :  { %v113_v42 = vshll.u32 %v930_v40, %v101_v28  ;;  %v116_v45 = vshll.u32 %v931_v43, %v101_v28  ;;  %vm119_vm2 = vcmp.lt.s32.totalorder %v100_v31, 1  ;;  %vm122_vm3 = vcmp.lt.s32.totalorder %v100_v31, 4 }
  0xc8   :  { %v105_v36 = vshrl.u32 %v928_v34, %v102_v30  ;;  %v108_v38 = vshrl.u32 %v929_v37, %v102_v30  ;;  %v111_v41 = vshrl.u32 %v930_v40, %v102_v30  ;;  %v114_v44 = vshrl.u32 %v931_v43, %v102_v30 }
  0xc9   :  { %v117_v47 = vshrl.u32 %v932_v46, %v102_v30  ;;  %v103_v57 = vshrl.u32 %v927_v32, %v102_v30  ;;  %vm121_vm4 = vcmp.lt.s32.totalorder %v100_v31, 3  ;;  %vm120_vm5 = vcmp.lt.s32.totalorder %v100_v31, 2 }
  0xca   :  { %v106_v49 = vor.u32 %v105_v36, %v104_v33  ;;  %v109_v50 = vor.u32 %v108_v38, %v107_v35  ;;  %v112_v51 = vor.u32 %v111_v41, %v110_v39  ;;  %v115_v52 = vor.u32 %v114_v44, %v113_v42 }
  0xcb   :  { %v118_v53 = vor.u32 %v117_v47, %v116_v45 }
  0xcc   :  { %v124_v54 = vsel %vm122_vm3, %v112_v51, 2102212464  ;;  %v127_v55 = vsel %vm119_vm2, %v106_v49, %v109_v50  ;;  %v131_v56 = vsel %vm119_vm2, %v109_v50, %v112_v51  ;;  %v128_v58 = vsel %vm122_vm3, %v115_v52, 920167782 }
  0xcd   :  { %v132_v59 = vsel %vm122_vm3, %v118_v53, 1326507024  ;;  %v129_v60 = vsel %vm121_vm4, %v112_v51, %v128_v58  ;;  %v123_v63 = vsel %vm119_vm2, %v103_v57, %v106_v49  ;;  %v125_v0 = vsel %vm121_vm4, %v109_v50, %v124_v54  ;;  %v809_v58 = vld [vmem:[#allocation8] sm:$0xff]  }
  0xce   :  { %v133_v61 = vsel %vm121_vm4, %v115_v52, %v132_v59  ;;  %v130_v1 = vsel %vm120_vm5, %v127_v55, %v129_v60  ;;  %v126_v8 = vsel %vm120_vm5, %v123_v63, %v125_v0  ;;  %v810_v59 = vld [vmem:[#allocation8 + $0x8] sm:$0xff]   ;;  %v812_v60 = vld [vmem:[#allocation8 + $0x18] sm:$0xff]   ;;  %v815_v63 = vld [vmem:[#allocation8 + $0x30] sm:$0xff]  }
  0xcf   :  { %v134_v2 = vsel %vm120_vm5, %v131_v56, %v133_v61  ;;  %v1062_v6 = vmul.u32.u64.low %v135_v62, %v130_v1  ;;  %v1063_v7 = vmul.u32.u64.high %v135_v62, %v130_v1, %v1062_v6  ;;  %v142_v10 = vmul.u32 %v135_v62, %v126_v8  ;;  %v813_v61 = vld [vmem:[#allocation8 + $0x20] sm:$0xff]   ;;  %v816_v0 = vld [vmem:[#allocation8 + $0x38] sm:$0xff]  }
  0xd0   :  { %v1059_v3 = vmul.u32.u64.low %v135_v62, %v134_v2  ;;  %v1060_v5 = vmul.u32.u64.high %v135_v62, %v134_v2, %v1059_v3  ;;  %v814_v62 = vld [vmem:[#allocation8 + $0x28] sm:$0xff]  }
  0xd1   :  { %v145_v9 = vadd.s32 1, %v1063_v7  ;;  %v675_v3 = vld [vmem:[%s1105_s4] ss:$0 sm:$0xff] }
  0xd2   :  { %vm144_vm6 = vc.u32 %v1060_v5, %v1062_v6  ;;  %v143_v23 = vadd.s32 %v1062_v6, %v1060_v5 }
  0xd3   :  { %v146_v11 = vsel %vm144_vm6, %v145_v9, %v1063_v7 }
  0xd4   :  { %v147_v12 = vadd.s32 %v146_v11, %v142_v10 }
  0xd6   :  { %v148_v13 = vadd.s32 536870912, %v147_v12 }
  0xd8   :  { %v149_v14 = vshrl.u32 %v148_v13, 30 }
  0xda   :  { %v150_v15 = vshll.u32 %v149_v14, 30  ;;  %v173_v36 = vsub.s32 4, %v149_v14 }
  0xdc   :  { %v151_v16 = vsub.s32 %v147_v12, %v150_v15  ;;  %v174_v39 = vsel %vm89_vm8, %v173_v36, %v149_v14 }
  0xdd   :  { %v176_v41 = vsel %vm88_vm9, 0, %v174_v39 }
  0xde   :  { %v153_v17 = vsub.s32 0, %v151_v16  ;;  %v284_v42 = vadd.s32 3, %v176_v41  ;;  %v180_v44 = vand.u32 3, %v176_v41 }
  0xe0   :  { %v652_v18 = vmin.u32 %v153_v17, %v151_v16  ;;  %v285_v43 = vand.u32 3, %v284_v42  ;;  %vm185_vm11 = vcmp.eq.s32.totalorder %v180_v44, 2  ;;  %vm182_vm13 = vcmp.eq.s32.totalorder %v180_v44, 0 }
  0xe1   :  { %vm181_vm15 = vcmp.lt.s32.totalorder %v180_v44, 2 }
  0xe2   :  { %v155_v19 = vclz %v652_v18  ;;  %vm290_vm10 = vcmp.eq.s32.totalorder %v285_v43, 2  ;;  %vm287_vm12 = vcmp.eq.s32.totalorder %v285_v43, 0  ;;  %vm286_vm14 = vcmp.lt.s32.totalorder %v285_v43, 2 }
  0xe4   :  { %v653_v20 = vadd.s32 4294967294, %v155_v19  ;;  %v677_v19 = vld [vmem:[%s1107_s6] ss:$0 sm:$0xff] }
  0xe6   :  { %vm654_vm7 = vcmp.lt.s32.totalorder %v653_v20, 0 }
  0xe7   :  { %v158_v22 = vsel %vm654_vm7, 0, %v653_v20 }
  0xe8   :  { %v159_v24 = vsub.s32 32, %v158_v22  ;;  %v163_v25 = vsub.s32 4294967266, %v158_v22  ;;  %v160_v27 = vshll.u32 %v151_v16, %v158_v22 }
  0xea   :  { %v161_v28 = vshrl.u32 %v143_v23, %v159_v24  ;;  %v164_v29 = vadd.s32 127, %v163_v25 }
  0xec   :  { %v162_v30 = vor.u32 %v161_v28, %v160_v27  ;;  %v165_v31 = vshll.u32 %v164_v29, 23 }
  0xee   :  { %v166_v32 = vor.u32 4788187, %v165_v31  ;;  %v169_v34 = vcvt.s32.f32 %v162_v30 }
  0xf0   :  { %v167_v33 = vand.u32 2147483647, %v166_v32 }
  0xf2   :  { %v170_v35 = vmul.f32 %v169_v34, %v167_v33 }
  0xf4   :  { %v171_v37 = vxor.u32 2147483648, %v170_v35 }
  0xf6   :  { %v172_v38 = vsel %vm89_vm8, %v171_v37, %v170_v35 }
  0xf7   :  { %v175_v40 = vsel %vm88_vm9, %v1053_v21, %v172_v38  ;;  %v811_v21 = vld [vmem:[#allocation8 + $0x10] sm:$0xff]  }
  0xf8   :  { %817 = vcosq.f32 %v175_v40 }
  0xf9   :  { %819 = vsinq.f32 %v175_v40 }
 0x102   :  { %v818_v45 = vpop.eup %817 }
 0x103   :  { %v820_v46 = vpop.eup %819  ;;  %v186_v47 = vxor.u32 2147483648, %v818_v45 }
 0x104   :  { %v183_v48 = vxor.u32 2147483648, %v820_v46 }
 0x105   :  { %v292_v49 = vsel %vm290_vm10, %v186_v47, %v820_v46  ;;  %v187_v26 = vsel %vm185_vm11, %v186_v47, %v820_v46 }
 0x106   :  { %v289_v50 = vsel %vm287_vm12, %v818_v45, %v183_v48  ;;  %v184_v51 = vsel %vm182_vm13, %v818_v45, %v183_v48 }
 0x107   :  { %v293_v52 = vsel %vm286_vm14, %v289_v50, %v292_v49  ;;  %v188_v53 = vsel %vm181_vm15, %v184_v51, %v187_v26 }
 0x108   :  { %v294_v54 = vsel %vm179_vm1, nan, %v293_v52  ;;  %v189_v55 = vsel %vm179_vm1, nan, %v188_v53 }
 0x109   :  { %v295_v56 = vpack.c.bf16 %v294_v54, %v294_v54  ;;  %v190_v57 = vpack.c.bf16 %v189_v55, %v189_v55 }
 0x10b   :  { %730 = vmatmul.mubr.bf16.vlgmr.msra.gmra.mrb[0].mxu0 %v295_v56  ;;  %750 = vmatmul.mubr.bf16.vlgmr.msra.gmra.mrb[0].mxu1 %v190_v57 }
 0x10c   :  { %769 = vmatprep.mubr.msk.bf16.mxu0 %vm926_vm0, %v925_v4  ;;  %754 = vmatpush3.bf16.msra.mxu0 %v809_v58 }
 0x10d   :  { %755 = vmatprep.subr.bf16.mxu0 %v925_v4 }
 0x110   :  { %756 = vmatpush3.bf16.msra.mxu0 %v810_v59 }
 0x111   :  { %757 = vmatprep.subr.bf16.mxu0 %v925_v4 }
 0x114   :  { %758 = vmatpush3.bf16.msra.mxu0 %v811_v21 }
 0x115   :  { %759 = vmatprep.subr.bf16.mxu0 %v925_v4 }
 0x118   :  { %760 = vmatpush3.bf16.msra.mxu0 %v812_v60 }
 0x119   :  { %761 = vmatprep.subr.bf16.mxu0 %v925_v4 }
 0x11c   :  { %762 = vmatpush3.bf16.msra.mxu0 %v813_v61 }
 0x11d   :  { %763 = vmatprep.subr.bf16.mxu0 %v925_v4 }
 0x120   :  { %764 = vmatpush3.bf16.msra.mxu0 %v814_v62 }
 0x121   :  { %765 = vmatprep.subr.bf16.mxu0 %v925_v4 }
 0x124   :  { %766 = vmatpush3.bf16.msra.mxu0 %v815_v63 }
 0x125   :  { %767 = vmatprep.subr.bf16.mxu0 %v925_v4 }
 0x128   :  { %768 = vmatpush3.bf16.msra.mxu0 %v816_v0 }
 0x1de   :  { %v410_v1 = vpop.f32.mrb[0].mxu0  ;;  %v498_v2 = vpop.f32.mrb[0].mxu1 }
 0x1df   :  { %v499_v5 = vadd.f32 %v498_v2, %v410_v1  ;;  %v731_v6 = vpop.f32.mrb[1].mxu0  ;;  %v751_v7 = vpop.f32.mrb[1].mxu1 }
 0x1e0   :  { %v413_v8 = vpop.f32.mrb[2].mxu0  ;;  %v501_v9 = vpop.f32.mrb[2].mxu1 }
 0x1e1   :  { %v511_v10 = vadd.f32 %v675_v3, %v499_v5  ;;  %v732_v11 = vpop.f32.mrb[3].mxu0  ;;  %v752_v12 = vpop.f32.mrb[3].mxu1 }
 0x1e3   :  { %v676_v13 = vmul.f32 -1.442695, %v511_v10 }
 0x1e5   :  { %821 = vpow2.f32 %v676_v13 }
 0x1ef   :  { %v822_v14 = vpop.eup %821 }
 0x1f0   :  { %v515_v15 = vadd.f32 1.0, %v822_v14 }
 0x1f2   :  { %823 = vrcp.f32 %v515_v15 }
 0x1fc   :  { %v824_v4 = vpop.eup %823 }
 0x1fd   :  { %v518_v16 = vmul.f32 %v824_v4, %v511_v10 }
 0x1ff   :  { %v519_v17 = vpack.c.bf16 %v518_v16, %v518_v16 }
 0x201   :  { %520 = vst [vmem:[#allocation2] sm:$0xf] %v519_v17 }
 0x208   :  { %v521_v18 = vld [vmem:[#allocation2] sm:$0xf] }
 0x209   :  { %770 = vmatmul.mubr.bf16.vlgmr.msra.gmra.mrb[4].mxu0 %v521_v18 }
 0x2dc   :  { %v627_v20 = vpop.f32.mrb[4].mxu0 }
 0x2dd   :  { %v628_v22 = vadd.f32 %v677_v19, %v627_v20  ;;  %v771_v23 = vpop.f32.mrb[5].mxu0 }
 0x2de   :  { %v630_v24 = vpop.f32.mrb[6].mxu0 }
 0x2df   :  { %633 = vst [vmem:[#allocation9] sm:$0xff] %v628_v22  ;;  %v772_v25 = vpop.f32.mrb[7].mxu0 }
 0x2e0   :  { %902 = shalt.err (!%p899_p0)
}
 0x2e1   :  { %s903_s6 = scalar_lea.hbm %s1108_s7, 128 }
 0x2e2   :  { %p904_p1 = scmp.ne.s32.totalorder %s1108_s7, %s903_s6  ;;  %p907_p2 = scmp.lt.u32.totalorder %s903_s6, %s1108_s7 }
 0x2e4   :  { %p909_p3 = pnand %p907_p2, %p904_p1 }
 0x2e6   :  { %912 = shalt.err (!%p909_p3)
}
 0x2e7   :  { %643 = dma.vmem_to_hbm [thread:$0]  %s641_s19, 128, %s1108_s7, [#allocation5]  }
 0x2e8   :  { %917 = dma.done.wait [#allocation5], 128  }
 0x2e9   :  { %918 = vsyncadd [#allocation5], 4294967168 }
 0x2ea   :  { %647 = vsyncpa [#allocation4], 1 }
 0x2eb   :  { %648 = vsyncpa [#allocation7], 1 }
 0x2ec   :  { %649 = vsyncpa [#allocation5], 1 }

</bundles_post_ra>
